<compile_context>
chip_gen: v5e
topology: v5e:2x2
jax: 0.10.0
libtpu: 0.0.40
codegen_flags: <defaults>
</compile_context>

<pallas_src>
import functools

import jax
import jax.numpy as jnp
from jax.experimental import pallas as pl
from jax.experimental.pallas import tpu as pltpu


def hccf_fused_kernel(rn_ref, rnt_ref, u_ref, i_ref, ut_ref, it_ref,
                      out_ref, gnn_ref, hyper_ref, lat_ref, *, num_user):
    """One grid step == one propagation layer.

    rn_ref   : (U, I)   normalized user-item block  D_u^-1/2 R D_i^-1/2
    rnt_ref  : (I, U)   its transpose (precomputed once in the wrapper)
    u_ref    : (U, Dp)  user embeddings  (Dp = dim_E padded to 128)
    i_ref    : (I, Dp)  item embeddings
    ut_ref   : (Dp, U)  mult^2 * u.T   (hypergraph operand, pre-transposed)
    it_ref   : (Dp, I)  mult^2 * i.T
    out_ref  : (N, Dp)  running sum of all layer embeddings (== self.result)
    gnn_ref  : (N, Dp)  this layer's gcn output   (streamed per layer)
    hyper_ref: (N, Dp)  this layer's hgnn output  (streamed per layer)
    lat_ref  : (N, Dp)  VMEM scratch: previous-layer embeddings
    """
    layer = pl.program_id(0)
    U = num_user

    # Initialize the resident "lats[-1]" scratch with the concatenated embeds.
    @pl.when(layer == 0)
    def _init():
        lat_ref[:U, :] = u_ref[...]
        lat_ref[U:, :] = i_ref[...]

    lat_u = lat_ref[:U, :]
    lat_i = lat_ref[U:, :]

    # GCN layer on the bipartite blocks (no dense N x N matmul):
    #   tem_u = Rn   @ lat_i    (U, Dp)
    #   tem_i = Rn.T @ lat_u    (I, Dp)
    tem_u = jnp.dot(rn_ref[...], lat_i, preferred_element_type=jnp.float32)
    tem_i = jnp.dot(rnt_ref[...], lat_u, preferred_element_type=jnp.float32)

    # HGNN layer:  H @ (H.T @ X)  with  H = mult * embeds.
    # mult^2 is folded into ut_ref / it_ref; the (Dp, Dp) mid keeps the
    # contraction tiny compared to the N x Dp operands.
    mid_u = jnp.dot(ut_ref[...], lat_u, preferred_element_type=jnp.float32)
    h_u = jnp.dot(u_ref[...], mid_u, preferred_element_type=jnp.float32)
    mid_i = jnp.dot(it_ref[...], lat_i, preferred_element_type=jnp.float32)
    h_i = jnp.dot(i_ref[...], mid_i, preferred_element_type=jnp.float32)

    # Write user / item halves directly (no in-kernel concatenation).
    gnn_ref[:U, :] = tem_u
    gnn_ref[U:, :] = tem_i
    hyper_ref[:U, :] = h_u
    hyper_ref[U:, :] = h_i

    new_u = tem_u + h_u
    new_i = tem_i + h_i
    lat_ref[:U, :] = new_u
    lat_ref[U:, :] = new_i

    # Running sum accumulates directly in the (resident) output block.
    @pl.when(layer == 0)
    def _first():
        out_ref[:U, :] = u_ref[...] + new_u
        out_ref[U:, :] = i_ref[...] + new_i

    @pl.when(layer > 0)
    def _rest():
        out_ref[:U, :] = out_ref[:U, :] + new_u
        out_ref[U:, :] = out_ref[U:, :] + new_i


def hccf_forward(rn, u_emb, i_emb, *, n_layers, mult):
    """HCCF forward (keepRate = 1.0).  Returns (result, gnnLats, hyperLats)."""
    U, D = u_emb.shape
    I = i_emb.shape[0]
    N = U + I
    # Sublane alignment for the user/item split inside the kernel.
    assert U % 8 == 0 and I % 8 == 0, "pad num_user / num_item to multiples of 8"

    Dp = ((D + 127) // 128) * 128  # lane-dense pad (layout only, math unchanged)
    pad = Dp - D

    rn = rn.astype(jnp.float32)
    rnt = rn.T                                        # transpose hoisted: once, not per layer
    u_p = jnp.pad(u_emb.astype(jnp.float32), ((0, 0), (0, pad)))
    i_p = jnp.pad(i_emb.astype(jnp.float32), ((0, 0), (0, pad)))
    scale = float(mult) ** 2                          # mult folded into the small operand
    ut_p = u_p.T * scale                              # (Dp, U)
    it_p = i_p.T * scale                              # (Dp, I)

    kernel = functools.partial(hccf_fused_kernel, num_user=U)

    flops = n_layers * (4 * U * I * Dp + 4 * N * Dp * Dp)
    bytes_accessed = 4 * (2 * U * I + 2 * N * Dp + (2 * n_layers + 1) * N * Dp)

    grid_spec = pltpu.PrefetchScalarGridSpec(
        num_scalar_prefetch=0,
        grid=(n_layers,),
        in_specs=[
            pl.BlockSpec((U, I), lambda l: (0, 0)),        # Rn   (resident)
            pl.BlockSpec((I, U), lambda l: (0, 0)),        # Rn.T (resident)
            pl.BlockSpec((U, Dp), lambda l: (0, 0)),       # u
            pl.BlockSpec((I, Dp), lambda l: (0, 0)),       # i
            pl.BlockSpec((Dp, U), lambda l: (0, 0)),       # mult^2 * u.T
            pl.BlockSpec((Dp, I), lambda l: (0, 0)),       # mult^2 * i.T
        ],
        out_specs=(
            pl.BlockSpec((N, Dp), lambda l: (0, 0)),             # result (accumulator)
            pl.BlockSpec((None, N, Dp), lambda l: (l, 0, 0)),    # gnnLats[l+1]   (streamed)
            pl.BlockSpec((None, N, Dp), lambda l: (l, 0, 0)),    # hyperLats[l+1] (streamed)
        ),
        scratch_shapes=[pltpu.VMEM((N, Dp), jnp.float32)],       # lats[-1]
    )

    out_shapes = (
        jax.ShapeDtypeStruct((N, Dp), jnp.float32),
        jax.ShapeDtypeStruct((n_layers, N, Dp), jnp.float32),
        jax.ShapeDtypeStruct((n_layers, N, Dp), jnp.float32),
    )

    result_p, gnn_p, hyper_p = pl.pallas_call(
        kernel,
        grid_spec=grid_spec,
        out_shape=out_shapes,
        compiler_params=pltpu.CompilerParams(
            dimension_semantics=("arbitrary",),      # layers are sequential
            vmem_limit_bytes=32 * 1024 * 1024,
        ),
        cost_estimate=pl.CostEstimate(
            flops=int(flops), transcendentals=0, bytes_accessed=int(bytes_accessed)),
    )(rn, rnt, u_p, i_p, ut_p, it_p)

    # Un-pad and prepend the layer-0 entry (gnnLats[0] == hyperLats[0] == embeds0).
    embeds0 = jnp.concatenate([u_emb, i_emb], axis=0).astype(jnp.float32)
    result = result_p[:, :D]
    gnn_lats = jnp.concatenate([embeds0[None], gnn_p[:, :, :D]], axis=0)
    hyper_lats = jnp.concatenate([embeds0[None], hyper_p[:, :, :D]], axis=0)
    return result, gnn_lats, hyper_lats


def build_norm_rn(R):
    """Normalized user-item block of get_norm_adj_mat(): D_u^-1/2 R D_i^-1/2."""
    deg_u = (R > 0).astype(jnp.float32).sum(axis=1) + 1e-7
    deg_i = (R > 0).astype(jnp.float32).sum(axis=0) + 1e-7
    return (deg_u ** -0.5)[:, None] * R * (deg_i ** -0.5)[None, :]


def hccf_forward_ref(rn, u_emb, i_emb, *, n_layers, mult):
    """Pure-JAX reference matching the PyTorch forward (keepRate = 1.0)."""
    U, I = rn.shape
    adj = jnp.concatenate([
        jnp.concatenate([jnp.zeros((U, U), jnp.float32), rn], axis=1),
        jnp.concatenate([rn.T, jnp.zeros((I, I), jnp.float32)], axis=1),
    ], axis=0)
    embeds = jnp.concatenate([u_emb, i_emb], axis=0)
    lats = [embeds]
    gnn, hyper = [embeds], [embeds]
    uu_h = u_emb * mult
    ii_h = i_emb * mult
    for _ in range(n_layers):
        tem = adj @ lats[-1]
        h_u = uu_h @ (uu_h.T @ lats[-1][:U])
        h_i = ii_h @ (ii_h.T @ lats[-1][U:])
        hy = jnp.concatenate([h_u, h_i], axis=0)
        gnn.append(tem)
        hyper.append(hy)
        lats.append(tem + hy)
    return sum(lats), jnp.stack(gnn), jnp.stack(hyper)


if __name__ == "__main__":
    num_user, num_item, dim_E = 24, 40, 32
    n_layers, mult = 2, 1.5
    N = num_user + num_item

    key = jax.random.PRNGKey(0)
    ku, ki, kr = jax.random.split(key, 3)

    # Xavier-uniform init (same as nn.init.xavier_uniform_)
    bu = (6.0 / (num_user + dim_E)) ** 0.5
    bi = (6.0 / (num_item + dim_E)) ** 0.5
    u_emb = jax.random.uniform(ku, (num_user, dim_E), jnp.float32, -bu, bu)
    i_emb = jax.random.uniform(ki, (num_item, dim_E), jnp.float32, -bi, bi)

    # Deterministic synthetic user-item interaction matrix (binary)
    R = (jax.random.uniform(kr, (num_user, num_item)) < 0.2).astype(jnp.float32)
    rn = build_norm_rn(R)

    out, gnn_lats, hyper_lats = jax.block_until_ready(
        hccf_forward(rn, u_emb, i_emb, n_layers=n_layers, mult=mult))

    ref_out, ref_gnn, ref_hyper = hccf_forward_ref(
        rn, u_emb, i_emb, n_layers=n_layers, mult=mult)

    assert out.shape == (N, dim_E)
    assert gnn_lats.shape == (n_layers + 1, N, dim_E)
    assert hyper_lats.shape == (n_layers + 1, N, dim_E)
    assert jnp.allclose(out, ref_out, atol=1e-3, rtol=1e-3), "result mismatch"
    assert jnp.allclose(gnn_lats, ref_gnn, atol=1e-3, rtol=1e-3), "gnnLats mismatch"
    assert jnp.allclose(hyper_lats, ref_hyper, atol=1e-3, rtol=1e-3), "hyperLats mismatch"

    print("KERNEL_OK")
</pallas_src>

<mosaic_0001>
module attributes {stable_mosaic.version = 11 : i64} {
  func.func @hccf_fused_kernel(%arg0: i32, %arg1: memref<24x40xf32, #tpu.memory_space<vmem>>, %arg2: memref<40x24xf32, #tpu.memory_space<vmem>>, %arg3: memref<24x128xf32, #tpu.memory_space<vmem>>, %arg4: memref<40x128xf32, #tpu.memory_space<vmem>>, %arg5: memref<128x24xf32, #tpu.memory_space<vmem>>, %arg6: memref<128x40xf32, #tpu.memory_space<vmem>>, %arg7: memref<64x128xf32, #tpu.memory_space<vmem>>, %arg8: memref<1x64x128xf32, #tpu.memory_space<vmem>>, %arg9: memref<1x64x128xf32, #tpu.memory_space<vmem>>, %arg10: memref<64x128xf32, #tpu.memory_space<vmem>>) attributes {dimension_semantics = [#tpu.dimension_semantics<arbitrary>], iteration_bounds = array<i64: 2>, scalar_prefetch = 0 : i64, scratch_operands = 1 : i64, tpu.core_type = #tpu.core_type<tc>, window_params = [{pipeline_mode = #tpu.pipeline_mode<synchronous>, transform_indices = @transform_0, window_bounds = array<i64: 24, 40>}, {pipeline_mode = #tpu.pipeline_mode<synchronous>, transform_indices = @transform_1, window_bounds = array<i64: 40, 24>}, {pipeline_mode = #tpu.pipeline_mode<synchronous>, transform_indices = @transform_2, window_bounds = array<i64: 24, 128>}, {pipeline_mode = #tpu.pipeline_mode<synchronous>, transform_indices = @transform_3, window_bounds = array<i64: 40, 128>}, {pipeline_mode = #tpu.pipeline_mode<synchronous>, transform_indices = @transform_4, window_bounds = array<i64: 128, 24>}, {pipeline_mode = #tpu.pipeline_mode<synchronous>, transform_indices = @transform_5, window_bounds = array<i64: 128, 40>}, {pipeline_mode = #tpu.pipeline_mode<synchronous>, transform_indices = @transform_6, window_bounds = array<i64: 64, 128>}, {transform_indices = @transform_7, window_bounds = array<i64: 1, 64, 128>}, {transform_indices = @transform_8, window_bounds = array<i64: 1, 64, 128>}]} {
    %c0_i32 = arith.constant 0 : i32
    %0 = arith.cmpi eq, %arg0, %c0_i32 : i32
    %1 = arith.extui %0 : i1 to i32
    %c0_i32_0 = arith.constant 0 : i32
    %2 = arith.cmpi ne, %1, %c0_i32_0 : i32
    scf.if %2 {
      %c0_40 = arith.constant 0 : index
      %c0_41 = arith.constant 0 : index
      %39 = vector.load %arg3[%c0_40, %c0_41] : memref<24x128xf32, #tpu.memory_space<vmem>>, vector<24x128xf32>
      %c0_42 = arith.constant 0 : index
      %c0_43 = arith.constant 0 : index
      %40 = vector.load %arg10[%c0_42, %c0_43] : memref<64x128xf32, #tpu.memory_space<vmem>>, vector<24x128xf32>
      tpu.vector_store %arg10[%c0_42, %c0_43], %39 {strides = array<i32>} : memref<64x128xf32, #tpu.memory_space<vmem>>, vector<24x128xf32>,
      %c0_44 = arith.constant 0 : index
      %c0_45 = arith.constant 0 : index
      %41 = vector.load %arg4[%c0_44, %c0_45] : memref<40x128xf32, #tpu.memory_space<vmem>>, vector<40x128xf32>
      %c24_46 = arith.constant 24 : index
      %c0_47 = arith.constant 0 : index
      %42 = vector.load %arg10[%c24_46, %c0_47] : memref<64x128xf32, #tpu.memory_space<vmem>>, vector<40x128xf32>
      tpu.vector_store %arg10[%c24_46, %c0_47], %41 {strides = array<i32>} : memref<64x128xf32, #tpu.memory_space<vmem>>, vector<40x128xf32>,
    } else {
    }
    %c0 = arith.constant 0 : index
    %c0_1 = arith.constant 0 : index
    %3 = vector.load %arg10[%c0, %c0_1] : memref<64x128xf32, #tpu.memory_space<vmem>>, vector<24x128xf32>
    %c24 = arith.constant 24 : index
    %c0_2 = arith.constant 0 : index
    %4 = vector.load %arg10[%c24, %c0_2] : memref<64x128xf32, #tpu.memory_space<vmem>>, vector<40x128xf32>
    %c0_3 = arith.constant 0 : index
    %c0_4 = arith.constant 0 : index
    %5 = vector.load %arg1[%c0_3, %c0_4] : memref<24x40xf32, #tpu.memory_space<vmem>>, vector<24x40xf32>
    %cst = arith.constant dense<0.000000e+00> : vector<24x128xf32>
    %6 = tpu.matmul %5, %4, %cst {dimension_numbers = #tpu.dot_dimension_numbers<[1], [0], [0], [1], [0, 0, 1, 1], [], []>} : vector<24x40xf32>, vector<40x128xf32>, vector<24x128xf32> -> vector<24x128xf32>
    %c0_5 = arith.constant 0 : index
    %c0_6 = arith.constant 0 : index
    %7 = vector.load %arg2[%c0_5, %c0_6] : memref<40x24xf32, #tpu.memory_space<vmem>>, vector<40x24xf32>
    %cst_7 = arith.constant dense<0.000000e+00> : vector<40x128xf32>
    %8 = tpu.matmul %7, %3, %cst_7 {dimension_numbers = #tpu.dot_dimension_numbers<[1], [0], [0], [1], [0, 0, 1, 1], [], []>} : vector<40x24xf32>, vector<24x128xf32>, vector<40x128xf32> -> vector<40x128xf32>
    %c0_8 = arith.constant 0 : index
    %c0_9 = arith.constant 0 : index
    %9 = vector.load %arg5[%c0_8, %c0_9] : memref<128x24xf32, #tpu.memory_space<vmem>>, vector<128x24xf32>
    %cst_10 = arith.constant dense<0.000000e+00> : vector<128x128xf32>
    %10 = tpu.matmul %9, %3, %cst_10 {dimension_numbers = #tpu.dot_dimension_numbers<[1], [0], [0], [1], [0, 0, 1, 1], [], []>} : vector<128x24xf32>, vector<24x128xf32>, vector<128x128xf32> -> vector<128x128xf32>
    %c0_11 = arith.constant 0 : index
    %c0_12 = arith.constant 0 : index
    %11 = vector.load %arg3[%c0_11, %c0_12] : memref<24x128xf32, #tpu.memory_space<vmem>>, vector<24x128xf32>
    %cst_13 = arith.constant dense<0.000000e+00> : vector<24x128xf32>
    %12 = tpu.matmul %11, %10, %cst_13 {dimension_numbers = #tpu.dot_dimension_numbers<[1], [0], [0], [1], [0, 0, 1, 1], [], []>} : vector<24x128xf32>, vector<128x128xf32>, vector<24x128xf32> -> vector<24x128xf32>
    %c0_14 = arith.constant 0 : index
    %c0_15 = arith.constant 0 : index
    %13 = vector.load %arg6[%c0_14, %c0_15] : memref<128x40xf32, #tpu.memory_space<vmem>>, vector<128x40xf32>
    %cst_16 = arith.constant dense<0.000000e+00> : vector<128x128xf32>
    %14 = tpu.matmul %13, %4, %cst_16 {dimension_numbers = #tpu.dot_dimension_numbers<[1], [0], [0], [1], [0, 0, 1, 1], [], []>} : vector<128x40xf32>, vector<40x128xf32>, vector<128x128xf32> -> vector<128x128xf32>
    %c0_17 = arith.constant 0 : index
    %c0_18 = arith.constant 0 : index
    %15 = vector.load %arg4[%c0_17, %c0_18] : memref<40x128xf32, #tpu.memory_space<vmem>>, vector<40x128xf32>
    %cst_19 = arith.constant dense<0.000000e+00> : vector<40x128xf32>
    %16 = tpu.matmul %15, %14, %cst_19 {dimension_numbers = #tpu.dot_dimension_numbers<[1], [0], [0], [1], [0, 0, 1, 1], [], []>} : vector<40x128xf32>, vector<128x128xf32>, vector<40x128xf32> -> vector<40x128xf32>
    %c0_20 = arith.constant 0 : index
    %c0_21 = arith.constant 0 : index
    %c0_22 = arith.constant 0 : index
    %17 = vector.load %arg8[%c0_20, %c0_21, %c0_22] : memref<1x64x128xf32, #tpu.memory_space<vmem>>, vector<1x24x128xf32>
    %18 = vector.shape_cast %17 : vector<1x24x128xf32> to vector<24x128xf32>
    %19 = vector.shape_cast %6 : vector<24x128xf32> to vector<1x24x128xf32>
    tpu.vector_store %arg8[%c0_20, %c0_21, %c0_22], %19 {strides = array<i32>} : memref<1x64x128xf32, #tpu.memory_space<vmem>>, vector<1x24x128xf32>,
    %c0_23 = arith.constant 0 : index
    %c24_24 = arith.constant 24 : index
    %c0_25 = arith.constant 0 : index
    %20 = vector.load %arg8[%c0_23, %c24_24, %c0_25] : memref<1x64x128xf32, #tpu.memory_space<vmem>>, vector<1x40x128xf32>
    %21 = vector.shape_cast %20 : vector<1x40x128xf32> to vector<40x128xf32>
    %22 = vector.shape_cast %8 : vector<40x128xf32> to vector<1x40x128xf32>
    tpu.vector_store %arg8[%c0_23, %c24_24, %c0_25], %22 {strides = array<i32>} : memref<1x64x128xf32, #tpu.memory_space<vmem>>, vector<1x40x128xf32>,
    %c0_26 = arith.constant 0 : index
    %c0_27 = arith.constant 0 : index
    %c0_28 = arith.constant 0 : index
    %23 = vector.load %arg9[%c0_26, %c0_27, %c0_28] : memref<1x64x128xf32, #tpu.memory_space<vmem>>, vector<1x24x128xf32>
    %24 = vector.shape_cast %23 : vector<1x24x128xf32> to vector<24x128xf32>
    %25 = vector.shape_cast %12 : vector<24x128xf32> to vector<1x24x128xf32>
    tpu.vector_store %arg9[%c0_26, %c0_27, %c0_28], %25 {strides = array<i32>} : memref<1x64x128xf32, #tpu.memory_space<vmem>>, vector<1x24x128xf32>,
    %c0_29 = arith.constant 0 : index
    %c24_30 = arith.constant 24 : index
    %c0_31 = arith.constant 0 : index
    %26 = vector.load %arg9[%c0_29, %c24_30, %c0_31] : memref<1x64x128xf32, #tpu.memory_space<vmem>>, vector<1x40x128xf32>
    %27 = vector.shape_cast %26 : vector<1x40x128xf32> to vector<40x128xf32>
    %28 = vector.shape_cast %16 : vector<40x128xf32> to vector<1x40x128xf32>
    tpu.vector_store %arg9[%c0_29, %c24_30, %c0_31], %28 {strides = array<i32>} : memref<1x64x128xf32, #tpu.memory_space<vmem>>, vector<1x40x128xf32>,
    %29 = arith.addf %6, %12 : vector<24x128xf32>
    %30 = arith.addf %8, %16 : vector<40x128xf32>
    %c0_32 = arith.constant 0 : index
    %c0_33 = arith.constant 0 : index
    %31 = vector.load %arg10[%c0_32, %c0_33] : memref<64x128xf32, #tpu.memory_space<vmem>>, vector<24x128xf32>
    tpu.vector_store %arg10[%c0_32, %c0_33], %29 {strides = array<i32>} : memref<64x128xf32, #tpu.memory_space<vmem>>, vector<24x128xf32>,
    %c24_34 = arith.constant 24 : index
    %c0_35 = arith.constant 0 : index
    %32 = vector.load %arg10[%c24_34, %c0_35] : memref<64x128xf32, #tpu.memory_space<vmem>>, vector<40x128xf32>
    tpu.vector_store %arg10[%c24_34, %c0_35], %30 {strides = array<i32>} : memref<64x128xf32, #tpu.memory_space<vmem>>, vector<40x128xf32>,
    %c0_i32_36 = arith.constant 0 : i32
    %33 = arith.cmpi eq, %arg0, %c0_i32_36 : i32
    %34 = arith.extui %33 : i1 to i32
    %c0_i32_37 = arith.constant 0 : i32
    %35 = arith.cmpi ne, %34, %c0_i32_37 : i32
    scf.if %35 {
      %c0_40 = arith.constant 0 : index
      %c0_41 = arith.constant 0 : index
      %39 = vector.load %arg3[%c0_40, %c0_41] : memref<24x128xf32, #tpu.memory_space<vmem>>, vector<24x128xf32>
      %40 = arith.addf %39, %29 : vector<24x128xf32>
      %c0_42 = arith.constant 0 : index
      %c0_43 = arith.constant 0 : index
      %41 = vector.load %arg7[%c0_42, %c0_43] : memref<64x128xf32, #tpu.memory_space<vmem>>, vector<24x128xf32>
      tpu.vector_store %arg7[%c0_42, %c0_43], %40 {strides = array<i32>} : memref<64x128xf32, #tpu.memory_space<vmem>>, vector<24x128xf32>,
      %c0_44 = arith.constant 0 : index
      %c0_45 = arith.constant 0 : index
      %42 = vector.load %arg4[%c0_44, %c0_45] : memref<40x128xf32, #tpu.memory_space<vmem>>, vector<40x128xf32>
      %43 = arith.addf %42, %30 : vector<40x128xf32>
      %c24_46 = arith.constant 24 : index
      %c0_47 = arith.constant 0 : index
      %44 = vector.load %arg7[%c24_46, %c0_47] : memref<64x128xf32, #tpu.memory_space<vmem>>, vector<40x128xf32>
      tpu.vector_store %arg7[%c24_46, %c0_47], %43 {strides = array<i32>} : memref<64x128xf32, #tpu.memory_space<vmem>>, vector<40x128xf32>,
    } else {
    }
    %c0_i32_38 = arith.constant 0 : i32
    %36 = arith.cmpi sgt, %arg0, %c0_i32_38 : i32
    %37 = arith.extui %36 : i1 to i32
    %c0_i32_39 = arith.constant 0 : i32
    %38 = arith.cmpi ne, %37, %c0_i32_39 : i32
    scf.if %38 {
      %c0_40 = arith.constant 0 : index
      %c0_41 = arith.constant 0 : index
      %39 = vector.load %arg7[%c0_40, %c0_41] : memref<64x128xf32, #tpu.memory_space<vmem>>, vector<24x128xf32>
      %40 = arith.addf %39, %29 : vector<24x128xf32>
      %c0_42 = arith.constant 0 : index
      %c0_43 = arith.constant 0 : index
      %41 = vector.load %arg7[%c0_42, %c0_43] : memref<64x128xf32, #tpu.memory_space<vmem>>, vector<24x128xf32>
      tpu.vector_store %arg7[%c0_42, %c0_43], %40 {strides = array<i32>} : memref<64x128xf32, #tpu.memory_space<vmem>>, vector<24x128xf32>,
      %c24_44 = arith.constant 24 : index
      %c0_45 = arith.constant 0 : index
      %42 = vector.load %arg7[%c24_44, %c0_45] : memref<64x128xf32, #tpu.memory_space<vmem>>, vector<40x128xf32>
      %43 = arith.addf %42, %30 : vector<40x128xf32>
      %c24_46 = arith.constant 24 : index
      %c0_47 = arith.constant 0 : index
      %44 = vector.load %arg7[%c24_46, %c0_47] : memref<64x128xf32, #tpu.memory_space<vmem>>, vector<40x128xf32>
      tpu.vector_store %arg7[%c24_46, %c0_47], %43 {strides = array<i32>} : memref<64x128xf32, #tpu.memory_space<vmem>>, vector<40x128xf32>,
    } else {
    }
    return
  }
  func.func @transform_0(%arg0: i32) -> (i32, i32) {
    %c0_i32 = arith.constant 0 : i32
    %c0_i32_0 = arith.constant 0 : i32
    %c0_i32_1 = arith.constant 0 : i32
    return %c0_i32, %c0_i32_0 : i32, i32
  }
  func.func @transform_1(%arg0: i32) -> (i32, i32) {
    %c0_i32 = arith.constant 0 : i32
    %c0_i32_0 = arith.constant 0 : i32
    %c0_i32_1 = arith.constant 0 : i32
    return %c0_i32, %c0_i32_0 : i32, i32
  }
  func.func @transform_2(%arg0: i32) -> (i32, i32) {
    %c0_i32 = arith.constant 0 : i32
    %c0_i32_0 = arith.constant 0 : i32
    %c0_i32_1 = arith.constant 0 : i32
    return %c0_i32, %c0_i32_0 : i32, i32
  }
  func.func @transform_3(%arg0: i32) -> (i32, i32) {
    %c0_i32 = arith.constant 0 : i32
    %c0_i32_0 = arith.constant 0 : i32
    %c0_i32_1 = arith.constant 0 : i32
    return %c0_i32, %c0_i32_0 : i32, i32
  }
  func.func @transform_4(%arg0: i32) -> (i32, i32) {
    %c0_i32 = arith.constant 0 : i32
    %c0_i32_0 = arith.constant 0 : i32
    %c0_i32_1 = arith.constant 0 : i32
    return %c0_i32, %c0_i32_0 : i32, i32
  }
  func.func @transform_5(%arg0: i32) -> (i32, i32) {
    %c0_i32 = arith.constant 0 : i32
    %c0_i32_0 = arith.constant 0 : i32
    %c0_i32_1 = arith.constant 0 : i32
    return %c0_i32, %c0_i32_0 : i32, i32
  }
  func.func @transform_6(%arg0: i32) -> (i32, i32) {
    %c0_i32 = arith.constant 0 : i32
    %c0_i32_0 = arith.constant 0 : i32
    %c0_i32_1 = arith.constant 0 : i32
    return %c0_i32, %c0_i32_0 : i32, i32
  }
  func.func @transform_7(%arg0: i32) -> (i32, i32, i32) {
    %c0_i32 = arith.constant 0 : i32
    %c0_i32_0 = arith.constant 0 : i32
    %c0_i32_1 = arith.constant 0 : i32
    return %arg0, %c0_i32, %c0_i32_0 : i32, i32, i32
  }
  func.func @transform_8(%arg0: i32) -> (i32, i32, i32) {
    %c0_i32 = arith.constant 0 : i32
    %c0_i32_0 = arith.constant 0 : i32
    %c0_i32_1 = arith.constant 0 : i32
    return %arg0, %c0_i32, %c0_i32_0 : i32, i32, i32
  }
}

</mosaic_0001>

<bundles_post_ra>
// kernel: tpu_custom_call.1
= control target key start
LH: loop header
LB: loop body
LE: loop exit
PB: predicated region body
PF: predicated region fallthrough
CT: control target
= control target key end

     0   :  { %s1641_s0 = inlined_call_operand.vmem [shape: f32[24,40], index: 0, kind: input, shape index: {}]   ;;  %s1642_s1 = inlined_call_operand.vmem [shape: f32[40,24], index: 1, kind: input, shape index: {}]   ;;  %s1643_s2 = inlined_call_operand.vmem [shape: f32[24,128], index: 2, kind: input, shape index: {}]   ;;  %s1644_s3 = inlined_call_operand.vmem [shape: f32[40,128], index: 3, kind: input, shape index: {}]   ;;  %s1645_s4 = inlined_call_operand.vmem [shape: f32[128,24], index: 4, kind: input, shape index: {}]   ;;  %s1646_s5 = inlined_call_operand.vmem [shape: f32[128,40], index: 5, kind: input, shape index: {}]   ;;  %s1647_s6 = inlined_call_operand.hbm [shape: f32[64,128], index: 6, kind: output, shape index: {0}]   ;;  %s1648_s7 = inlined_call_operand.hbm [shape: f32[2,64,128], index: 7, kind: output, shape index: {1}]   ;;  %s1649_s8 = inlined_call_operand.hbm [shape: f32[2,64,128], index: 8, kind: output, shape index: {2}]  }
   0x1   :  { %1651 = sst [smem:[#allocation10_spill]] %s1641_s0 }
   0x2   :  { %1652 = sst [smem:[#allocation11_spill]] %s1642_s1 }
   0x3   :  { %1653 = sst [smem:[#allocation12_spill]] %s1643_s2 }
   0x4   :  { %14 = vsyncpa [#allocation4], 0 }
   0x5   :  { %15 = vsyncpa [#allocation6], 0 }
   0x6   :  { %17 = vsyncpa [#allocation6 + $0x1], 0  ;;  %s1257_s27 = smov 0   ;;  %s1259_s28 = smov 0  }
   0x7   :  { %s1261_s29 = smov 0   ;;  %s1263_s30 = smov 0  }
   0x8 LB: > { %s1276_s9 = sadd.s32 4294967295, %s1207_s30   ;;  %s1650_s10 = sadd.s32 4294967294, %s1207_s30   ;;  %s1207_s30 = sphi %s1263_s30, %s1665_s30   ;;  %s1203_s29 = sphi %s1261_s29, %s1664_s29   ;;  %s1199_s28 = sphi %s1259_s28, %s1663_s28   ;;  %s1195_s27 = sphi %s1257_s27, %s1662_s27  }
   0x9   : > { %s1280_s11 = sadd.s32 1, %s1207_s30   ;;  %s177_s12 = sadd.s32 1, %s1203_s29 }
   0xa   : > { %s174_s13 = ssub.s32 %s1207_s30, %s1280_s11  ;;  %p187_p0 = scmp.ne.s32.totalorder %s1203_s29, %s1199_s28 }
   0xb   : > { %p175_p1 = scmp.eq.s32.totalorder %s174_s13, 0  ;;  %p188_p2 = scmp.eq.s32.totalorder %s1276_s9, 1 }
   0xc   : > { %p193_p3 = scmp.ne.s32.totalorder %s1199_s28, %s1195_s27  ;;  %p194_p4 = scmp.eq.s32.totalorder %s1650_s10, 1 }
   0xd   : > { %s1292_s14 = scalar_select %p175_p1, %s1203_s29, %s177_s12  }
   0xe   : > { %p1296_p5 = por %p188_p2, %p187_p0  ;;  %p1300_p6 = por %p194_p4, %p193_p3 }
   0xf   : > { %p969_p7 = scmp.ge.s32.totalorder %s1207_s30, 1  ;;  %p256_p8 = scmp.lt.s32.totalorder %s1207_s30, 3 }
  0x11   : > { %p257_p9 = pnand %p969_p7, %p256_p8 }
  0x12   : > { %s280_s17 = sand.u32 (!%p257_p9), 1, %s1199_s28   ;;  %p972_p10 = scmp.ne.s32.totalorder (!%p257_p9), %s1276_s9, 0 }
  0x13   : > { %260 = sbr.rel (%p257_p9) target bundleno = 780 (0x30c), region = 44  ;;  %s970_s18 = sshll.u32 (!%p257_p9), %s280_s17, 6 }
  0x14   : > { %s1307_s19 = scalar_lea.vmem (!%p257_p9), [#allocation5], %s970_s18  ;;  %s1309_s20 = scalar_lea.vmem (!%p257_p9), [#allocation7], %s970_s18 }
  0x18   : > { %293 = sbr.rel (%p972_p10) target bundleno = 38 (0x26), region = 48  ;;  %s1656_s2 = sld [smem:[#allocation12_spill]] (!%p972_p10) }
  0x1d   : > { %v300_v3 = vld [vmem:[%s1644_s3] sm:$0xff]  ;;  %v301_v4 = vld [vmem:[%s1644_s3 + $0x8] sm:$0xff]  ;;  %v302_v5 = vld [vmem:[%s1644_s3 + $0x10] sm:$0xff] }
  0x1e   : > { %v294_v0 = vld [vmem:[%s1656_s2] sm:$0xff]  ;;  %v295_v1 = vld [vmem:[%s1656_s2 + $0x8] sm:$0xff]  ;;  %v296_v2 = vld [vmem:[%s1656_s2 + $0x10] sm:$0xff]  ;;  %305 = vst [vmem:[#allocation2 + $0x10] sm:$0xff] %v300_v3 }
  0x1f   : > { %297 = vst [vmem:[#allocation2 + $0x30] sm:$0xff] %v294_v0  ;;  %v303_v6 = vld [vmem:[%s1644_s3 + $0x18] sm:$0xff]  ;;  %v304_v7 = vld [vmem:[%s1644_s3 + $0x20] sm:$0xff] }
  0x20   : > { %298 = vst [vmem:[#allocation2] sm:$0xff] %v295_v1 }
  0x21   : > { %299 = vst [vmem:[#allocation2 + $0x18] sm:$0xff] %v296_v2 }
  0x22   : > { %306 = vst [vmem:[#allocation2 + $0x8] sm:$0xff] %v301_v4 }
  0x23   : > { %307 = vst [vmem:[#allocation2 + $0x20] sm:$0xff] %v302_v5 }
  0x24   : > { %308 = vst [vmem:[#allocation2 + $0x28] sm:$0xff] %v303_v6 }
  0x25   : > { %309 = vst [vmem:[#allocation2 + $0x38] sm:$0xff] %v304_v7 }
  0x26 PF: > { %v310_v10 = vld [vmem:[#allocation2 + $0x30] sm:$0xff]  ;;  %vm362_vm0 = vcmask 195584   ;;  %v410_v11 = vld [vmem:[%s1645_s4] sm:$0xff]  ;;  %v411_v12 = vld [vmem:[%s1645_s4 + $0x8] sm:$0xff]  ;;  %s1657_s0 = sld [smem:[#allocation10_spill]]  ;;  %vm321_vm1 = vcmask 326656  }
  0x27   : > { %v311_v9 = vld [vmem:[#allocation2] sm:$0xff]  ;;  %v412_v13 = vld [vmem:[%s1645_s4 + $0x10] sm:$0xff]  ;;  %v413_v14 = vld [vmem:[%s1645_s4 + $0x18] sm:$0xff]  ;;  %s1658_s2 = sld [smem:[#allocation12_spill]] }
  0x28   : > { %v312_v8 = vld [vmem:[#allocation2 + $0x18] sm:$0xff]  ;;  %v414_v15 = vld [vmem:[%s1645_s4 + $0x20] sm:$0xff]  ;;  %v415_v16 = vld [vmem:[%s1645_s4 + $0x28] sm:$0xff]  ;;  %s1659_s1 = sld [smem:[#allocation11_spill]] }
  0x29   : > { %487 = vmatpush.msra.mxu2 %v312_v8  ;;  %391 = vmatpush.msra.mxu1 %v312_v8  ;;  %v416_v17 = vld [vmem:[%s1645_s4 + $0x30] sm:$0xff]  ;;  %v417_v18 = vld [vmem:[%s1645_s4 + $0x38] sm:$0xff]  ;;  %v418_v19 = vld [vmem:[%s1645_s4 + $0x40] sm:$0xff] }
  0x2a   : > { %v419_v20 = vld [vmem:[%s1645_s4 + $0x48] sm:$0xff]  ;;  %v420_v21 = vld [vmem:[%s1645_s4 + $0x50] sm:$0xff]  ;;  %v421_v22 = vld [vmem:[%s1645_s4 + $0x58] sm:$0xff] }
  0x2b   : > { %488 = vmatpush.msra.mxu2 %v311_v9  ;;  %392 = vmatpush.msra.mxu1 %v311_v9  ;;  %v422_v23 = vld [vmem:[%s1645_s4 + $0x60] sm:$0xff]  ;;  %v423_v24 = vld [vmem:[%s1645_s4 + $0x68] sm:$0xff]  ;;  %v424_v25 = vld [vmem:[%s1645_s4 + $0x70] sm:$0xff] }
  0x2c   : > { %v425_v26 = vld [vmem:[%s1645_s4 + $0x78] sm:$0xff]  ;;  %v316_v41 = vld [vmem:[#allocation2 + $0x28] sm:$0xff]  ;;  %v315_v42 = vld [vmem:[#allocation2 + $0x20] sm:$0xff] }
  0x2d   : > { %489 = vmatpush.msra.mxu2 %v310_v10  ;;  %393 = vmatpush.msra.mxu1 %v310_v10  ;;  %v317_v39 = vld [vmem:[#allocation2 + $0x38] sm:$0xff]  ;;  %v314_v43 = vld [vmem:[#allocation2 + $0x8] sm:$0xff]  ;;  %v313_v44 = vld [vmem:[#allocation2 + $0x10] sm:$0xff] }
  0x2e   : > { %981 = vmatmul.msk.f32.vlgmr.msra.gmra.mxu2 %vm362_vm0, %v410_v11  ;;  %342 = vmatpush.msra.mxu0 %v317_v39  ;;  %v318_v46 = vld [vmem:[%s1657_s0] sm:$0xff]  ;;  %v319_v48 = vld [vmem:[%s1657_s0 + $0x8] sm:$0xff]  ;;  %v320_v50 = vld [vmem:[%s1657_s0 + $0x10] sm:$0xff] }
  0x2f   : > { %v568_v51 = vld [vmem:[%s1646_s5] sm:$0xff]  ;;  %v569_v52 = vld [vmem:[%s1646_s5 + $0x8] sm:$0xff]  ;;  %v570_v53 = vld [vmem:[%s1646_s5 + $0x10] sm:$0xff] }
  0x30   : > { %343 = vmatpush.msra.mxu0 %v316_v41  ;;  %v539_v54 = vld [vmem:[%s1658_s2] sm:$0xff]  ;;  %v571_v55 = vld [vmem:[%s1646_s5 + $0x18] sm:$0xff]  ;;  %v540_v56 = vld [vmem:[%s1658_s2 + $0x8] sm:$0xff] }
  0x31   : > { %v572_v57 = vld [vmem:[%s1646_s5 + $0x20] sm:$0xff]  ;;  %v541_v58 = vld [vmem:[%s1658_s2 + $0x10] sm:$0xff]  ;;  %v573_v59 = vld [vmem:[%s1646_s5 + $0x28] sm:$0xff]  ;;  %s1660_s2 = sld [smem:[#allocation12_spill]] (!%p972_p10) }
  0x32   : > { %344 = vmatpush.msra.mxu0 %v315_v42  ;;  %v578_v60 = vld [vmem:[%s1646_s5 + $0x50] sm:$0xff]  ;;  %v579_v62 = vld [vmem:[%s1646_s5 + $0x58] sm:$0xff]  ;;  %v580_v0 = vld [vmem:[%s1646_s5 + $0x60] sm:$0xff] }
  0x33   : > { %v574_v61 = vld [vmem:[%s1646_s5 + $0x30] sm:$0xff]  ;;  %v575_v63 = vld [vmem:[%s1646_s5 + $0x38] sm:$0xff]  ;;  %v576_v1 = vld [vmem:[%s1646_s5 + $0x40] sm:$0xff] }
  0x34   : > { %345 = vmatpush.msra.mxu0 %v314_v43  ;;  %v581_v2 = vld [vmem:[%s1646_s5 + $0x68] sm:$0xff]  ;;  %v582_v4 = vld [vmem:[%s1646_s5 + $0x70] sm:$0xff]  ;;  %v583_v5 = vld [vmem:[%s1646_s5 + $0x78] sm:$0xff] }
  0x35   : > { %v577_v3 = vld [vmem:[%s1646_s5 + $0x48] sm:$0xff] }
  0x36   : > { %982 = vmatmul.msk.f32.gmra.mxu2 %vm362_vm0, %v411_v12  ;;  %346 = vmatpush.msra.mxu0 %v313_v44 }
  0x37   : > { %973 = vmatmul.msk.f32.vlgmr.msra.gmra.mxu0 %vm321_vm1, %v318_v46 }
  0x38   : > { %643 = vmatpush.msrb.mxu0 %v317_v39 }
  0x3a   : > { %644 = vmatpush.msrb.mxu0 %v316_v41 }
  0x3c   : > { %645 = vmatpush.msrb.mxu0 %v315_v42 }
  0x3e   : > { %983 = vmatmul.msk.f32.gmra.mxu2 %vm362_vm0, %v412_v13  ;;  %646 = vmatpush.msrb.mxu0 %v314_v43 }
  0x3f   : > { %974 = vmatmul.msk.f32.gmra.mxu0 %vm321_vm1, %v319_v48 }
  0x40   : > { %647 = vmatpush.msrb.mxu0 %v313_v44 }
  0x46   : > { %984 = vmatmul.msk.f32.gmra.mxu2 %vm362_vm0, %v413_v14 }
  0x47   : > { %975 = vmatmul.msk.f32.gmra.mxu0 %vm321_vm1, %v320_v50 }
  0x4e   : > { %985 = vmatmul.msk.f32.gmra.mxu2 %vm362_vm0, %v414_v15 }
  0x4f   : > { %997 = vmatmul.msk.f32.vlgmr.msrb.gmra.mxu0 %vm321_vm1, %v568_v51 }
  0x56   : > { %986 = vmatmul.msk.f32.gmra.mxu2 %vm362_vm0, %v415_v16 }
  0x57   : > { %998 = vmatmul.msk.f32.gmra.mxu0 %vm321_vm1, %v569_v52 }
  0x5e   : > { %987 = vmatmul.msk.f32.gmra.mxu2 %vm362_vm0, %v416_v17 }
  0x5f   : > { %999 = vmatmul.msk.f32.gmra.mxu0 %vm321_vm1, %v570_v53 }
  0x66   : > { %988 = vmatmul.msk.f32.gmra.mxu2 %vm362_vm0, %v417_v18  ;;  %v357_v18 = vld [vmem:[%s1659_s1] sm:$0xff] }
  0x67   : > { %1000 = vmatmul.msk.f32.gmra.mxu0 %vm321_vm1, %v571_v55  ;;  %976 = vmatmul.msk.f32.vlgmr.msra.gmra.mxu1 %vm362_vm0, %v357_v18 }
  0x6e   : > { %989 = vmatmul.msk.f32.gmra.mxu2 %vm362_vm0, %v418_v19 }
  0x6f   : > { %1001 = vmatmul.msk.f32.gmra.mxu0 %vm321_vm1, %v572_v57 }
  0x76   : > { %990 = vmatmul.msk.f32.gmra.mxu2 %vm362_vm0, %v419_v20 }
  0x77   : > { %1002 = vmatmul.msk.f32.gmra.mxu0 %vm321_vm1, %v573_v59 }
  0x7e   : > { %991 = vmatmul.msk.f32.gmra.mxu2 %vm362_vm0, %v420_v21 }
  0x7f   : > { %1003 = vmatmul.msk.f32.gmra.mxu0 %vm321_vm1, %v574_v61 }
  0x86   : > { %992 = vmatmul.msk.f32.gmra.mxu2 %vm362_vm0, %v421_v22  ;;  %v358_v22 = vld [vmem:[%s1659_s1 + $0x8] sm:$0xff] }
  0x87   : > { %1004 = vmatmul.msk.f32.gmra.mxu0 %vm321_vm1, %v575_v63  ;;  %977 = vmatmul.msk.f32.gmra.mxu1 %vm362_vm0, %v358_v22 }
  0x8e   : > { %993 = vmatmul.msk.f32.gmra.mxu2 %vm362_vm0, %v422_v23 }
  0x8f   : > { %1005 = vmatmul.msk.f32.gmra.mxu0 %vm321_vm1, %v576_v1 }
  0x96   : > { %994 = vmatmul.msk.f32.gmra.mxu2 %vm362_vm0, %v423_v24 }
  0x97   : > { %1006 = vmatmul.msk.f32.gmra.mxu0 %vm321_vm1, %v577_v3 }
  0x9e   : > { %995 = vmatmul.msk.f32.gmra.mxu2 %vm362_vm0, %v424_v25  ;;  %v359_v25 = vld [vmem:[%s1659_s1 + $0x10] sm:$0xff] }
  0x9f   : > { %978 = vmatmul.msk.f32.gmra.mxu1 %vm362_vm0, %v359_v25 }
  0xa6   : > { %996 = vmatmul.msk.f32.gmra.mxu2 %vm362_vm0, %v425_v26 }
  0xb1   : > { %v491_v27 = vpop.f32.mrf.mxu2 }
  0xb4   : > { %v348_v6 = vpop.f32.mrf.mxu0 }
  0xb5   : > { %734 = vst [vmem:[%s1307_s19] sm:$0xff] %v348_v6 }
  0xb9   : > { %v494_v28 = vpop.f32.mrf.mxu2 }
  0xbc   : > { %v351_v7 = vpop.f32.mrf.mxu0 }
  0xbd   : > { %735 = vst [vmem:[%s1307_s19 + $0x8] sm:$0xff] %v351_v7 }
  0xc1   : > { %v497_v29 = vpop.f32.mrf.mxu2 }
  0xc4   : > { %v354_v8 = vpop.f32.mrf.mxu0 }
  0xc5   : > { %736 = vst [vmem:[%s1307_s19 + $0x10] sm:$0xff] %v354_v8 }
  0xc9   : > { %v500_v30 = vpop.f32.mrf.mxu2 }
  0xcc   : > { %v649_v9 = vpop.f32.mrf.mxu0 }
  0xd1   : > { %v503_v31 = vpop.f32.mrf.mxu2 }
  0xd4   : > { %v652_v10 = vpop.f32.mrf.mxu0 }
  0xd9   : > { %v506_v32 = vpop.f32.mrf.mxu2 }
  0xdc   : > { %v655_v13 = vpop.f32.mrf.mxu0 }
  0xe1   : > { %v509_v33 = vpop.f32.mrf.mxu2 }
  0xe4   : > { %v658_v16 = vpop.f32.mrf.mxu0 }
  0xe9   : > { %v512_v34 = vpop.f32.mrf.mxu2 }
  0xec   : > { %v661_v21 = vpop.f32.mrf.mxu0 }
  0xf1   : > { %v515_v35 = vpop.f32.mrf.mxu2 }
  0xf4   : > { %v664_v24 = vpop.f32.mrf.mxu0 }
  0xf9   : > { %v518_v36 = vpop.f32.mrf.mxu2 }
 0x101   : > { %v521_v37 = vpop.f32.mrf.mxu2 }
 0x109   : > { %v524_v38 = vpop.f32.mrf.mxu2 }
 0x111   : > { %v527_v40 = vpop.f32.mrf.mxu2 }
 0x119   : > { %v530_v45 = vpop.f32.mrf.mxu2 }
 0x121   : > { %v533_v47 = vpop.f32.mrf.mxu2 }
 0x129   : > { %v536_v49 = vpop.f32.mrf.mxu2 }
 0x12a   : > { %542 = vmatpush.msra.mxu3 %v536_v49 }
 0x12c   : > { %543 = vmatpush.msra.mxu3 %v533_v47 }
 0x12e   : > { %544 = vmatpush.msra.mxu3 %v530_v45 }
 0x130   : > { %545 = vmatpush.msra.mxu3 %v527_v40  ;;  %v701_v40 = vld [vmem:[%s1644_s3 + $0x20] sm:$0xff] }
 0x132   : > { %546 = vmatpush.msra.mxu3 %v524_v38  ;;  %v699_v38 = vld [vmem:[%s1644_s3 + $0x10] sm:$0xff] }
 0x134   : > { %547 = vmatpush.msra.mxu3 %v521_v37  ;;  %v698_v37 = vld [vmem:[%s1644_s3 + $0x8] sm:$0xff] }
 0x136   : > { %548 = vmatpush.msra.mxu3 %v518_v36  ;;  %v697_v36 = vld [vmem:[%s1644_s3] sm:$0xff] }
 0x138   : > { %549 = vmatpush.msra.mxu3 %v515_v35 }
 0x13a   : > { %550 = vmatpush.msra.mxu3 %v512_v34 }
 0x13c   : > { %551 = vmatpush.msra.mxu3 %v509_v33 }
 0x13e   : > { %552 = vmatpush.msra.mxu3 %v506_v32 }
 0x140   : > { %553 = vmatpush.msra.mxu3 %v503_v31  ;;  %v361_v31 = vld [vmem:[%s1659_s1 + $0x20] sm:$0xff] }
 0x142   : > { %554 = vmatpush.msra.mxu3 %v500_v30 }
 0x144   : > { %555 = vmatpush.msra.mxu3 %v497_v29 }
 0x146   : > { %556 = vmatpush.msra.mxu3 %v494_v28  ;;  %v360_v28 = vld [vmem:[%s1659_s1 + $0x18] sm:$0xff] }
 0x147   : > { %979 = vmatmul.msk.f32.gmra.mxu1 %vm362_vm0, %v360_v28 }
 0x148   : > { %557 = vmatpush.msra.mxu3 %v491_v27  ;;  %v667_v27 = vpop.f32.mrf.mxu0 }
 0x149   : > { %558 = vmatmul.f32.vlgmr.msra.gmra.mxu3 %v539_v54 }
 0x14a   : > { %1027 = vmatpush.msrb.mxu3 %v317_v39  ;;  %v700_v39 = vld [vmem:[%s1644_s3 + $0x18] sm:$0xff] }
 0x14c   : > { %1028 = vmatpush.msrb.mxu3 %v316_v41  ;;  %v395_v41 = vpop.f32.mrf.mxu1 }
 0x14d   : > { %737 = vst [vmem:[%s1307_s19 + $0x18] sm:$0xff] %v395_v41 }
 0x14e   : > { %1029 = vmatpush.msrb.mxu3 %v315_v42 }
 0x14f   : > { %980 = vmatmul.msk.f32.gmra.mxu1 %vm362_vm0, %v361_v31 }
 0x150   : > { %1030 = vmatpush.msrb.mxu3 %v314_v43  ;;  %v670_v30 = vpop.f32.mrf.mxu0 }
 0x151   : > { %561 = vmatmul.f32.gmra.mxu3 %v540_v56 }
 0x152   : > { %1031 = vmatpush.msrb.mxu3 %v313_v44 }
 0x154   : > { %v398_v42 = vpop.f32.mrf.mxu1 }
 0x155   : > { %738 = vst [vmem:[%s1307_s19 + $0x20] sm:$0xff] %v398_v42 }
 0x158   : > { %v673_v34 = vpop.f32.mrf.mxu0 }
 0x159   : > { %564 = vmatmul.f32.gmra.mxu3 %v541_v58 }
 0x15c   : > { %v401_v43 = vpop.f32.mrf.mxu1 }
 0x15d   : > { %739 = vst [vmem:[%s1307_s19 + $0x28] sm:$0xff] %v401_v43 }
 0x160   : > { %v676_v35 = vpop.f32.mrf.mxu0 }
 0x161   : > { %1007 = vmatmul.msk.f32.vlgmr.msrb.gmra.mxu3 %vm321_vm1, %v578_v60 }
 0x169   : > { %1008 = vmatmul.msk.f32.gmra.mxu3 %vm321_vm1, %v579_v62 }
 0x171   : > { %1009 = vmatmul.msk.f32.gmra.mxu3 %vm321_vm1, %v580_v0 }
 0x179   : > { %1010 = vmatmul.msk.f32.gmra.mxu3 %vm321_vm1, %v581_v2 }
 0x181   : > { %1011 = vmatmul.msk.f32.gmra.mxu3 %vm321_vm1, %v582_v4 }
 0x189   : > { %1012 = vmatmul.msk.f32.gmra.mxu3 %vm321_vm1, %v583_v5 }
 0x1c4   : > { %v404_v44 = vpop.f32.mrf.mxu1 }
 0x1c5   : > { %740 = vst [vmem:[%s1307_s19 + $0x30] sm:$0xff] %v404_v44 }
 0x1cc   : > { %v559_v11 = vpop.f32.mrf.mxu3  ;;  %v407_v45 = vpop.f32.mrf.mxu1 }
 0x1cd   : > { %742 = vst [vmem:[%s1309_s20] sm:$0xff] %v559_v11  ;;  %v1491_v12 = vadd.f32 %v559_v11, %v348_v6 }
 0x1ce   : > { %741 = vst [vmem:[%s1307_s19 + $0x38] sm:$0xff] %v407_v45 }
 0x1cf   : > { %758 = vst [vmem:[#allocation2 + $0x30] sm:$0xff] %v1491_v12 }
 0x1d4   : > { %v562_v14 = vpop.f32.mrf.mxu3 }
 0x1d5   : > { %743 = vst [vmem:[%s1309_s20 + $0x8] sm:$0xff] %v562_v14  ;;  %v1495_v15 = vadd.f32 %v562_v14, %v351_v7 }
 0x1d7   : > { %759 = vst [vmem:[#allocation2] sm:$0xff] %v1495_v15 }
 0x1dc   : > { %v565_v17 = vpop.f32.mrf.mxu3 }
 0x1dd   : > { %744 = vst [vmem:[%s1309_s20 + $0x10] sm:$0xff] %v565_v17  ;;  %v1502_v19 = vadd.f32 %v565_v17, %v354_v8 }
 0x1df   : > { %760 = vst [vmem:[#allocation2 + $0x18] sm:$0xff] %v1502_v19 }
 0x1e4   : > { %v679_v20 = vpop.f32.mrf.mxu3 }
 0x1ec   : > { %v682_v23 = vpop.f32.mrf.mxu3 }
 0x1f4   : > { %v685_v26 = vpop.f32.mrf.mxu3 }
 0x1fc   : > { %v688_v29 = vpop.f32.mrf.mxu3 }
 0x204   : > { %v691_v32 = vpop.f32.mrf.mxu3 }
 0x20c   : > { %v694_v33 = vpop.f32.mrf.mxu3 }
 0x20d   : > { %702 = vmatpush.msrb.mxu1 %v694_v33 }
 0x20f   : > { %703 = vmatpush.msrb.mxu1 %v691_v32 }
 0x211   : > { %704 = vmatpush.msrb.mxu1 %v688_v29 }
 0x213   : > { %705 = vmatpush.msrb.mxu1 %v685_v26 }
 0x215   : > { %706 = vmatpush.msrb.mxu1 %v682_v23 }
 0x217   : > { %707 = vmatpush.msrb.mxu1 %v679_v20 }
 0x219   : > { %708 = vmatpush.msrb.mxu1 %v676_v35 }
 0x21b   : > { %709 = vmatpush.msrb.mxu1 %v673_v34 }
 0x21d   : > { %710 = vmatpush.msrb.mxu1 %v670_v30 }
 0x21f   : > { %711 = vmatpush.msrb.mxu1 %v667_v27 }
 0x221   : > { %712 = vmatpush.msrb.mxu1 %v664_v24 }
 0x223   : > { %713 = vmatpush.msrb.mxu1 %v661_v21 }
 0x225   : > { %714 = vmatpush.msrb.mxu1 %v658_v16 }
 0x227   : > { %715 = vmatpush.msrb.mxu1 %v655_v13 }
 0x229   : > { %716 = vmatpush.msrb.mxu1 %v652_v10 }
 0x22b   : > { %717 = vmatpush.msrb.mxu1 %v649_v9 }
 0x22c   : > { %718 = vmatmul.f32.vlgmr.msrb.gmra.mxu1 %v697_v36 }
 0x234   : > { %721 = vmatmul.f32.gmra.mxu1 %v698_v37 }
 0x23c   : > { %724 = vmatmul.f32.gmra.mxu1 %v699_v38 }
 0x244   : > { %727 = vmatmul.f32.gmra.mxu1 %v700_v39 }
 0x24c   : > { %730 = vmatmul.f32.gmra.mxu1 %v701_v40 }
 0x2a9   : > { %v719_v46 = vpop.f32.mrf.mxu1 }
 0x2aa   : > { %745 = vst [vmem:[%s1309_s20 + $0x18] sm:$0xff] %v719_v46  ;;  %v753_v47 = vadd.f32 %v719_v46, %v395_v41 }
 0x2ac   : > { %761 = vst [vmem:[#allocation2 + $0x10] sm:$0xff] %v753_v47 }
 0x2b1   : > { %v722_v48 = vpop.f32.mrf.mxu1 }
 0x2b2   : > { %746 = vst [vmem:[%s1309_s20 + $0x20] sm:$0xff] %v722_v48  ;;  %v754_v49 = vadd.f32 %v722_v48, %v398_v42 }
 0x2b4   : > { %762 = vst [vmem:[#allocation2 + $0x8] sm:$0xff] %v754_v49 }
 0x2b9   : > { %v725_v50 = vpop.f32.mrf.mxu1 }
 0x2ba   : > { %747 = vst [vmem:[%s1309_s20 + $0x28] sm:$0xff] %v725_v50  ;;  %v755_v51 = vadd.f32 %v725_v50, %v401_v43 }
 0x2bc   : > { %763 = vst [vmem:[#allocation2 + $0x20] sm:$0xff] %v755_v51 }
 0x2c1   : > { %v728_v52 = vpop.f32.mrf.mxu1 }
 0x2c2   : > { %748 = vst [vmem:[%s1309_s20 + $0x30] sm:$0xff] %v728_v52  ;;  %v756_v53 = vadd.f32 %v728_v52, %v404_v44 }
 0x2c4   : > { %764 = vst [vmem:[#allocation2 + $0x28] sm:$0xff] %v756_v53 }
 0x2c8   : > { %768 = sbr.rel (%p972_p10) target bundleno = 728 (0x2d8), region = 52 }
 0x2c9   : > { %v731_v54 = vpop.f32.mrf.mxu1 }
 0x2ca   : > { %749 = vst [vmem:[%s1309_s20 + $0x38] sm:$0xff] %v731_v54  ;;  %v757_v55 = vadd.f32 %v731_v54, %v407_v45 }
 0x2cc   : > { %765 = vst [vmem:[#allocation2 + $0x38] sm:$0xff] %v757_v55 }
 0x2cd   : > { %v769_v56 = vld [vmem:[%s1660_s2] sm:$0xff]  ;;  %v770_v57 = vld [vmem:[%s1660_s2 + $0x8] sm:$0xff]  ;;  %v771_v58 = vld [vmem:[%s1660_s2 + $0x10] sm:$0xff] }
 0x2ce   : > { %v772_v59 = vadd.f32 %v769_v56, %v1491_v12  ;;  %v773_v60 = vadd.f32 %v770_v57, %v1495_v15  ;;  %v774_v61 = vadd.f32 %v771_v58, %v1502_v19  ;;  %v778_v62 = vld [vmem:[%s1644_s3] sm:$0xff]  ;;  %v779_v63 = vld [vmem:[%s1644_s3 + $0x8] sm:$0xff]  ;;  %v780_v0 = vld [vmem:[%s1644_s3 + $0x10] sm:$0xff] }
 0x2cf   : > { %v783_v1 = vadd.f32 %v778_v62, %v753_v47  ;;  %v781_v2 = vld [vmem:[%s1644_s3 + $0x18] sm:$0xff]  ;;  %v784_v3 = vadd.f32 %v779_v63, %v754_v49  ;;  %v782_v4 = vld [vmem:[%s1644_s3 + $0x20] sm:$0xff]  ;;  %v785_v5 = vadd.f32 %v780_v0, %v755_v51 }
 0x2d0   : > { %775 = vst [vmem:[#allocation3] sm:$0xff] %v772_v59  ;;  %v786_v6 = vadd.f32 %v781_v2, %v756_v53  ;;  %v787_v7 = vadd.f32 %v782_v4, %v757_v55 }
 0x2d1   : > { %776 = vst [vmem:[#allocation3 + $0x8] sm:$0xff] %v773_v60 }
 0x2d2   : > { %777 = vst [vmem:[#allocation3 + $0x10] sm:$0xff] %v774_v61 }
 0x2d3   : > { %788 = vst [vmem:[#allocation3 + $0x18] sm:$0xff] %v783_v1 }
 0x2d4   : > { %789 = vst [vmem:[#allocation3 + $0x20] sm:$0xff] %v784_v3 }
 0x2d5   : > { %790 = vst [vmem:[#allocation3 + $0x28] sm:$0xff] %v785_v5 }
 0x2d6   : > { %791 = vst [vmem:[#allocation3 + $0x30] sm:$0xff] %v786_v6 }
 0x2d7   : > { %792 = vst [vmem:[#allocation3 + $0x38] sm:$0xff] %v787_v7 }
 0x2d8 PF: > { %p1014_p11 = scmp.le.s32.totalorder %s1276_s9, 0 }
 0x2da   : > { %796 = sbr.rel (%p1014_p11) target bundleno = 746 (0x2ea), region = 56 }
 0x2df   : > { %v797_v8 = vld [vmem:[#allocation3] sm:$0xff]  ;;  %v798_v9 = vld [vmem:[#allocation3 + $0x8] sm:$0xff]  ;;  %v799_v10 = vld [vmem:[#allocation3 + $0x10] sm:$0xff] }
 0x2e0   : > { %v800_v11 = vadd.f32 %v797_v8, %v1491_v12  ;;  %v801_v13 = vadd.f32 %v798_v9, %v1495_v15  ;;  %v802_v14 = vadd.f32 %v799_v10, %v1502_v19  ;;  %v806_v16 = vld [vmem:[#allocation3 + $0x18] sm:$0xff]  ;;  %v807_v17 = vld [vmem:[#allocation3 + $0x20] sm:$0xff]  ;;  %v808_v18 = vld [vmem:[#allocation3 + $0x28] sm:$0xff] }
 0x2e1   : > { %v811_v20 = vadd.f32 %v806_v16, %v753_v47  ;;  %v809_v21 = vld [vmem:[#allocation3 + $0x30] sm:$0xff]  ;;  %v812_v22 = vadd.f32 %v807_v17, %v754_v49  ;;  %v810_v23 = vld [vmem:[#allocation3 + $0x38] sm:$0xff]  ;;  %v813_v24 = vadd.f32 %v808_v18, %v755_v51 }
 0x2e2   : > { %803 = vst [vmem:[#allocation3] sm:$0xff] %v800_v11  ;;  %v814_v25 = vadd.f32 %v809_v21, %v756_v53  ;;  %v815_v26 = vadd.f32 %v810_v23, %v757_v55 }
 0x2e3   : > { %804 = vst [vmem:[#allocation3 + $0x8] sm:$0xff] %v801_v13 }
 0x2e4   : > { %805 = vst [vmem:[#allocation3 + $0x10] sm:$0xff] %v802_v14 }
 0x2e5   : > { %816 = vst [vmem:[#allocation3 + $0x18] sm:$0xff] %v811_v20 }
 0x2e6   : > { %817 = vst [vmem:[#allocation3 + $0x20] sm:$0xff] %v812_v22 }
 0x2e7   : > { %818 = vst [vmem:[#allocation3 + $0x28] sm:$0xff] %v813_v24 }
 0x2e8   : > { %819 = vst [vmem:[#allocation3 + $0x30] sm:$0xff] %v814_v25 }
 0x2e9   : > { %820 = vst [vmem:[#allocation3 + $0x38] sm:$0xff] %v815_v26 }
 0x2ea PF: > { %s821_s12 = sand.u32 1, %s1276_s9   ;;  %s1025_s13 = sshll.u32 %s1276_s9, 6 }
 0x2eb   : > { %s853_s17 = sshll.u32 %s1307_s19, 4  ;;  %s852_s22 = scalar_lea.hbm %s1648_s7, %s1025_s13  ;;  %s854_s17 = int_to_ptr.vmem [resolvable:$true] %s853_s17 }
 0x2ec   : > { %s855_s23 = sshll.u32 %s852_s22, 4  ;;  %s869_s26 = scalar_lea.hbm %s1649_s8, %s1025_s13  ;;  %s856_s23 = int_to_ptr.hbm [resolvable:$true] %s855_s23 }
 0x2ed   : > { %s872_s27 = sshll.u32 %s869_s26, 4  ;;  %s1589_s10 = scalar_lea.sflag [#allocation6], %s821_s12  ;;  %s873_s27 = int_to_ptr.hbm [resolvable:$true] %s872_s27 }
 0x2ee   : > { %s1099_s0 = sshra.s32 %s856_s23, 4  ;;  %s1105_s21 = scalar_lea.hbm %s1648_s7, 128  ;;  %s1100_s0 = int_to_ptr.hbm [resolvable:$true] %s1099_s0 }
 0x2ef   : > { %s1101_s1 = scalar_lea.hbm %s1100_s0, 64  ;;  %p1106_p1 = scmp.lt.s32.totalorder %s1100_s0, %s1648_s7 }
 0x2f0   : > { %p1102_p12 = scmp.ne.s32.totalorder %s1100_s0, %s1101_s1  ;;  %p1107_p3 = scmp.lt.s32.totalorder %s1105_s21, %s1101_s1 }
 0x2f2   : > { %p1103_p13 = pnand %p1102_p12, %p1296_p5  ;;  %p1108_p4 = por %p1107_p3, %p1106_p1 }
 0x2f4   : > { %p1104_p0 = pneg %p1103_p13 }
 0x2f6   : > { %p1109_p7 = pnand %p1108_p4, %p1104_p0 }
 0x2f8   : > { %1112 = shalt.err (!%p1109_p7)
}
 0x2f9   : > { %s1209_s12 = smov 128   ;;  %s1210_s13 = smov 8  }
 0x2fa   : > { %1034 = dma.vmem_to_hbm [thread:$0]  (%p1296_p5), %s854_s17, 1024, %s856_s23, %s1589_s10, %s1209_s12, %s1209_s12, %s1210_s13  }
 0x2fb   : > { %s1211_s24 = smov [#allocation3]   ;;  %s838_s2 = sshll.u32 %s1647_s6, 4  ;;  %s839_s2 = int_to_ptr.hbm [resolvable:$true] %s838_s2 }
 0x2fc   : > { %s836_s25 = sshll.u32 %s1211_s24, 4  ;;  %s870_s0 = sshll.u32 %s1309_s20, 4  ;;  %s837_s25 = int_to_ptr.vmem [resolvable:$true] %s836_s25  ;;  %s871_s0 = int_to_ptr.vmem [resolvable:$true] %s870_s0 }
 0x2fd   : > { %1033 = dma.vmem_to_hbm [thread:$0]  (%p188_p2), %s837_s25, 1024, %s839_s2, [#allocation4], %s1209_s12, %s1209_s12, %s1210_s13  }
 0x2fe   : > { %s1155_s1 = sshra.s32 %s873_s27, 4  ;;  %s1161_s21 = scalar_lea.hbm %s1649_s8, 128  ;;  %s1156_s1 = int_to_ptr.hbm [resolvable:$true] %s1155_s1 }
 0x2ff   : > { %s1157_s18 = scalar_lea.hbm %s1156_s1, 64  ;;  %p1162_p11 = scmp.lt.s32.totalorder %s1156_s1, %s1649_s8 }
 0x300   : > { %p1158_p8 = scmp.ne.s32.totalorder %s1156_s1, %s1157_s18  ;;  %p1163_p12 = scmp.lt.s32.totalorder %s1161_s21, %s1157_s18 }
 0x302   : > { %p1159_p9 = pnand %p1158_p8, %p1296_p5  ;;  %p1164_p13 = por %p1163_p12, %p1162_p11 }
 0x304   : > { %p1160_p10 = pneg %p1159_p9 }
 0x306   : > { %p1165_p0 = pnand %p1164_p13, %p1160_p10 }
 0x308   : > { %1168 = shalt.err (!%p1165_p0)
}
 0x309   : > { %1035 = dma.vmem_to_hbm [thread:$0]  (%p1296_p5), %s871_s0, 1024, %s873_s27, %s1589_s10, %s1209_s12, %s1209_s12, %s1210_s13  }
 0x30a   : > { %1186 = dma.done.wait (%p188_p2), [#allocation4], 1024  }
 0x30b   : > { %1188 = vsyncadd (%p188_p2), [#allocation4], 4294966272 }
 0x30c PF: > { %p1049_p1 = scmp.ge.s32.totalorder %s1207_s30, 2  ;;  %s1661_s20 = sadd.s32 4294967294, %s1207_s30  }
 0x30d   : > { %s892_s25 = sand.u32 1, %s1661_s20  }
 0x30e   : > { %p1041_p3 = pnand %p1049_p1, %p1300_p6  ;;  %s893_s26 = scalar_lea.sflag [#allocation6], %s892_s25 }
 0x310   : > { %p1042_p4 = pneg %p1041_p3 }
 0x312   : > { %1190 = dma.done.wait (%p1042_p4), %s893_s26, 2048  }
 0x313   : > { %1192 = vsyncadd (%p1042_p4), %s893_s26, 4294965248  ;;  %p20_p5 = scmp.ge.s32.totalorder %s1280_s11, 4   ;;  %s1662_s27 = smov %s1199_s28 }
 0x314   : > { %s1663_s28 = smov %s1203_s29  ;;  %s1664_s29 = smov %s1292_s14 }
 0x315   : > { %s1665_s30 = smov %s1280_s11  ;;  %22 = sbr.rel (!%p20_p5) target bundleno = 8 (0x8), region = 112 }
 0x31a   :  { %909 = vsyncpa [#allocation4], 1 }
 0x31b   :  { %911 = vsyncpa [#allocation4 + $0x1], 1 }
 0x31c   :  { %912 = vsyncpa [#allocation6], 1 }
 0x31d   :  { %914 = vsyncpa [#allocation6 + $0x1], 1 }

</bundles_post_ra>
